<compile_context>
chip_gen: v6e
topology: v6e:2x2x1
jax: 0.10.0
libtpu: 0.0.40
codegen_flags: <defaults>
</compile_context>

<pallas_src>
import functools

import jax
import jax.numpy as jnp
from jax.experimental import pallas as pl
from jax.experimental.pallas import tpu as pltpu
from collections import namedtuple

LossResult = namedtuple("LossResult", ["loss", "bce_loss", "l1_loss", "balancing_loss"])

_LANES = 128
_DEFAULT_BLOCK_ROWS = 1024  # 1024 x 128 x 4B = 512 KiB per f32 tile


def _cdiv(a, b):
    return -(-a // b)


# --------------------------------------------------------------------------- kernels
def _bce_kernel(p_ref, t_ref, out_ref, acc_ref, *, w0, w1, n_valid, block_rows):
    step = pl.program_id(0)

    @pl.when(step == 0)
    def _init():
        acc_ref[...] = jnp.zeros_like(acc_ref)

    p = p_ref[...].astype(jnp.float32)
    t = t_ref[...].astype(jnp.float32)
    p = jnp.clip(p, 1e-7, 1.0 - 1e-7)
    bce = -(w0 * t * jnp.log(p) + w1 * (1.0 - t) * jnp.log(1.0 - p))

    # mask out padding via the global element index (no mask array in HBM)
    rows = jax.lax.broadcasted_iota(jnp.int32, bce.shape, 0)
    lanes = jax.lax.broadcasted_iota(jnp.int32, bce.shape, 1)
    idx = (step * block_rows + rows) * _LANES + lanes
    bce = jnp.where(idx < n_valid, bce, 0.0)

    # only sublane reduce per tile; cross-lane reduce happens once at the end
    acc_ref[...] += jnp.sum(bce, axis=0, keepdims=True)

    @pl.when(step == pl.num_programs(0) - 1)
    def _fin():
        out_ref[0] = jnp.sum(acc_ref[...]) / n_valid


def _l1_kernel(x_ref, out_ref, acc_ref, *, lam_exp, lam_gate, n_exp, block_rows):
    step = pl.program_id(0)

    @pl.when(step == 0)
    def _init():
        acc_ref[...] = jnp.zeros_like(acc_ref)

    x = x_ref[...].astype(jnp.float32)
    rows = jax.lax.broadcasted_iota(jnp.int32, x.shape, 0)
    lanes = jax.lax.broadcasted_iota(jnp.int32, x.shape, 1)
    idx = (step * block_rows + rows) * _LANES + lanes
    # experts params occupy [0, n_exp); gate params after; zero padding adds 0 either way
    w = jnp.where(idx < n_exp, jnp.float32(lam_exp), jnp.float32(lam_gate))
    acc_ref[...] += jnp.sum(jnp.abs(x) * w, axis=0, keepdims=True)

    @pl.when(step == pl.num_programs(0) - 1)
    def _fin():
        out_ref[0] = jnp.sum(acc_ref[...])


def _balancing_kernel(g_ref, out_ref, acc_ref, *, lam, n_rows, n_experts):
    step = pl.program_id(0)

    @pl.when(step == 0)
    def _init():
        acc_ref[...] = jnp.zeros_like(acc_ref)

    g = g_ref[...].astype(jnp.float32)
    acc_ref[...] += jnp.sum(g, axis=0, keepdims=True)  # padded rows are 0 -> add nothing

    @pl.when(step == pl.num_programs(0) - 1)
    def _fin():
        usage = acc_ref[...] / n_rows                                  # (1, E_pad)
        lanes = jax.lax.broadcasted_iota(jnp.int32, usage.shape, 1)
        mask = (lanes < n_experts).astype(jnp.float32)
        mean_u = jnp.sum(usage * mask) / n_experts
        diff = (usage - mean_u) * mask
        var = jnp.sum(diff * diff) / (n_experts - 1)                   # unbiased (torch.std)
        out_ref[0] = lam * jnp.sqrt(var)


# --------------------------------------------------------------------------- wrappers
def _pad_1d_for_tiles(flat, block_rows=_DEFAULT_BLOCK_ROWS):
    """Zero-pad a 1-D array and reshape to a sublane/lane-dense (rows, 128) slab."""
    n = flat.shape[0]
    rows = max(8, _cdiv(max(n, 1), _LANES))
    rows = _cdiv(rows, 8) * 8
    if rows <= block_rows:
        br, grid = rows, 1
    else:
        rows = _cdiv(rows, block_rows) * block_rows
        br, grid = block_rows, rows // block_rows
    padded = jnp.pad(flat, (0, rows * _LANES - n))
    return padded.reshape(rows, _LANES), br, grid


def _scalar_reduction_call(kernel, inputs, block_shape, grid, scratch_lanes):
    return pl.pallas_call(
        kernel,
        out_shape=jax.ShapeDtypeStruct((1,), jnp.float32),
        grid_spec=pltpu.PrefetchScalarGridSpec(
            num_scalar_prefetch=0,
            grid=(grid,),
            in_specs=[pl.BlockSpec(block_shape, lambda i: (i, 0)) for _ in inputs],
            out_specs=pl.BlockSpec(memory_space=pltpu.MemorySpace.SMEM),
            scratch_shapes=[pltpu.VMEM((1, scratch_lanes), jnp.float32)],
        ),
        compiler_params=pltpu.CompilerParams(dimension_semantics=("arbitrary",)),
    )(*inputs)


def _bce_loss(y_pred, y_true, class_weights):
    p = y_pred.reshape(-1)
    t = y_true.reshape(-1)
    assert p.shape == t.shape, f"pred/target size mismatch {p.shape} vs {t.shape}"
    n = p.shape[0]
    w0, w1 = float(class_weights[0]), float(class_weights[1])
    p2, br, grid = _pad_1d_for_tiles(p)
    t2, _, _ = _pad_1d_for_tiles(t)
    kernel = functools.partial(_bce_kernel, w0=w0, w1=w1, n_valid=n, block_rows=br)
    return _scalar_reduction_call(kernel, (p2, t2), (br, _LANES), grid, _LANES)[0]


def _l1_loss(experts_params, gate_params, lambda_l1_exp, lambda_l1_gate):
    exp_leaves = [jnp.ravel(x).astype(jnp.float32)
                  for x in jax.tree_util.tree_leaves(experts_params)]
    gate_leaves = [jnp.ravel(x).astype(jnp.float32)
                   for x in jax.tree_util.tree_leaves(gate_params)]
    exp_flat = jnp.concatenate(exp_leaves) if exp_leaves else jnp.zeros((0,), jnp.float32)
    gate_flat = jnp.concatenate(gate_leaves) if gate_leaves else jnp.zeros((0,), jnp.float32)
    n_exp = exp_flat.shape[0]
    flat = jnp.concatenate([exp_flat, gate_flat])
    x2, br, grid = _pad_1d_for_tiles(flat)
    kernel = functools.partial(_l1_kernel, lam_exp=float(lambda_l1_exp),
                               lam_gate=float(lambda_l1_gate), n_exp=n_exp, block_rows=br)
    return _scalar_reduction_call(kernel, (x2,), (br, _LANES), grid, _LANES)[0]


def _balancing_loss(gate_probs, lambda_balancing, block_rows=_DEFAULT_BLOCK_ROWS):
    n, e = gate_probs.shape
    e_pad = _cdiv(e, _LANES) * _LANES
    rows = _cdiv(max(n, 1), 8) * 8
    if rows <= block_rows:
        br, grid = rows, 1
    else:
        rows = _cdiv(rows, block_rows) * block_rows
        br, grid = block_rows, rows // block_rows
    g2 = jnp.pad(gate_probs, ((0, rows - n), (0, e_pad - e)))
    kernel = functools.partial(_balancing_kernel, lam=float(lambda_balancing),
                               n_rows=n, n_experts=e)
    return _scalar_reduction_call(kernel, (g2,), (br, e_pad), grid, e_pad)[0]


def moe_loss(weighted_outputs, targets, gate_probs, experts_params, gate_params, *,
             lambda_l1_gate, lambda_l1_exp, lambda_balancing,
             class_weights=(1.0, 1.0), validation=False):
    """JAX/Pallas equivalent of MoELoss.forward.

    experts_params / gate_params are pytrees of arrays (the JAX analogue of
    model.experts.parameters() / model.gate.parameters()).
    """
    bce_loss = _bce_loss(weighted_outputs, targets, class_weights)

    if lambda_balancing != 0:
        balancing_loss = _balancing_loss(gate_probs, lambda_balancing)
    else:
        balancing_loss = jnp.zeros((), jnp.float32)

    if (lambda_l1_exp != 0 or lambda_l1_gate != 0) and not validation:
        l1_loss = _l1_loss(experts_params, gate_params, lambda_l1_exp, lambda_l1_gate)
    else:
        l1_loss = jnp.zeros((), jnp.float32)

    loss = bce_loss + balancing_loss + l1_loss
    return LossResult(loss, bce_loss, l1_loss, balancing_loss)


# --------------------------------------------------------------------------- reference
def _reference(weighted_outputs, targets, gate_probs, experts_params, gate_params,
               lambda_l1_gate, lambda_l1_exp, lambda_balancing, class_weights):
    w0, w1 = class_weights
    p = jnp.clip(weighted_outputs.reshape(-1).astype(jnp.float32), 1e-7, 1.0 - 1e-7)
    t = targets.reshape(-1).astype(jnp.float32)
    bce = jnp.mean(-w0 * t * jnp.log(p) - w1 * (1.0 - t) * jnp.log(1.0 - p))
    usage = gate_probs.astype(jnp.float32).mean(axis=0)
    bal = lambda_balancing * jnp.std(usage, ddof=1)
    l1 = (lambda_l1_exp * sum(jnp.sum(jnp.abs(x)) for x in experts_params)
          + lambda_l1_gate * sum(jnp.sum(jnp.abs(x)) for x in gate_params))
    return bce + bal + l1, bce, l1, bal


if __name__ == "__main__":
    key = jax.random.PRNGKey(0)
    ks = jax.random.split(key, 8)

    n, d_in, n_experts, hidden = 16, 8, 4, 32
    lambda_l1_gate, lambda_l1_exp, lambda_balancing = 0.1, 0.005, 0.0001
    class_weights = (1.0, 1.0)

    # moe_outputs.weighted_outputs: sigmoid probabilities (n, 1)
    weighted_outputs = jax.nn.sigmoid(jax.random.normal(ks[0], (n, 1), jnp.float32))
    # targets: binary labels (n,)
    targets = (jax.random.uniform(ks[1], (n,)) > 0.5).astype(jnp.float32)
    # moe_outputs.gate_probs: (n, n_experts)
    gate_probs = jax.nn.softmax(jax.random.normal(ks[2], (n, n_experts), jnp.float32), axis=-1)

    # model.experts.parameters() / model.gate.parameters() analogues
    experts_params = [
        jax.random.normal(ks[3], (n_experts, d_in, hidden), jnp.float32),
        jax.random.normal(ks[4], (n_experts, hidden), jnp.float32),
        jax.random.normal(ks[5], (n_experts, hidden, 1), jnp.float32),
    ]
    gate_params = [
        jax.random.normal(ks[6], (d_in, n_experts), jnp.float32),
        jax.random.normal(ks[7], (n_experts,), jnp.float32),
    ]

    result = moe_loss(weighted_outputs, targets, gate_probs, experts_params, gate_params,
                      lambda_l1_gate=lambda_l1_gate, lambda_l1_exp=lambda_l1_exp,
                      lambda_balancing=lambda_balancing, class_weights=class_weights,
                      validation=False)
    jax.block_until_ready(result)

    ref_loss, ref_bce, ref_l1, ref_bal = _reference(
        weighted_outputs, targets, gate_probs, experts_params, gate_params,
        lambda_l1_gate, lambda_l1_exp, lambda_balancing, class_weights)

    assert jnp.allclose(result.bce_loss, ref_bce, rtol=1e-5, atol=1e-5), (result.bce_loss, ref_bce)
    assert jnp.allclose(result.balancing_loss, ref_bal, rtol=1e-5, atol=1e-6), (result.balancing_loss, ref_bal)
    assert jnp.allclose(result.l1_loss, ref_l1, rtol=1e-5, atol=1e-5), (result.l1_loss, ref_l1)
    assert jnp.allclose(result.loss, ref_loss, rtol=1e-5, atol=1e-5), (result.loss, ref_loss)

    print("KERNEL_OK")
</pallas_src>

<mosaic_0001>
module attributes {stable_mosaic.version = 11 : i64} {
  func.func @_bce_kernel(%arg0: i32, %arg1: memref<8x128xf32, #tpu.memory_space<vmem>>, %arg2: memref<8x128xf32, #tpu.memory_space<vmem>>, %arg3: memref<1xf32, #tpu.memory_space<smem>>, %arg4: memref<1x128xf32, #tpu.memory_space<vmem>>) attributes {dimension_semantics = [#tpu.dimension_semantics<arbitrary>], iteration_bounds = array<i64: 1>, scalar_prefetch = 0 : i64, scratch_operands = 1 : i64, tpu.core_type = #tpu.core_type<tc>, window_params = [{transform_indices = @transform_0, window_bounds = array<i64: 8, 128>}, {transform_indices = @transform_1, window_bounds = array<i64: 8, 128>}, {transform_indices = @transform_2, window_bounds = array<i64: 1>}]} {
    %c0_i32 = arith.constant 0 : i32
    %0 = arith.cmpi eq, %arg0, %c0_i32 : i32
    %1 = arith.extui %0 : i1 to i32
    %c0_i32_0 = arith.constant 0 : i32
    %2 = arith.cmpi ne, %1, %c0_i32_0 : i32
    scf.if %2 {
      %cst_18 = arith.constant 0.000000e+00 : f32
      %44 = vector.broadcast %cst_18 : f32 to vector<1x128xf32>
      %c0_19 = arith.constant 0 : index
      %c0_20 = arith.constant 0 : index
      %45 = vector.load %arg4[%c0_19, %c0_20] : memref<1x128xf32, #tpu.memory_space<vmem>>, vector<1x128xf32>
      tpu.vector_store %arg4[%c0_19, %c0_20], %44 {strides = array<i32>} : memref<1x128xf32, #tpu.memory_space<vmem>>, vector<1x128xf32>,
    } else {
    }
    %c0 = arith.constant 0 : index
    %c0_1 = arith.constant 0 : index
    %3 = vector.load %arg1[%c0, %c0_1] : memref<8x128xf32, #tpu.memory_space<vmem>>, vector<8x128xf32>
    %c0_2 = arith.constant 0 : index
    %c0_3 = arith.constant 0 : index
    %4 = vector.load %arg2[%c0_2, %c0_3] : memref<8x128xf32, #tpu.memory_space<vmem>>, vector<8x128xf32>
    %cst = arith.constant 1.000000e-07 : f32
    %cst_4 = arith.constant 0.99999988 : f32
    %5 = vector.broadcast %cst : f32 to vector<8x128xf32>
    %6 = arith.maximumf %5, %3 : vector<8x128xf32>
    %7 = vector.broadcast %cst_4 : f32 to vector<8x128xf32>
    %8 = arith.minimumf %7, %6 : vector<8x128xf32>
    %cst_5 = arith.constant 1.000000e+00 : f32
    %9 = vector.broadcast %cst_5 : f32 to vector<8x128xf32>
    %10 = arith.mulf %9, %4 : vector<8x128xf32>
    %11 = math.log %8 : vector<8x128xf32>
    %12 = arith.mulf %10, %11 : vector<8x128xf32>
    %cst_6 = arith.constant 1.000000e+00 : f32
    %13 = vector.broadcast %cst_6 : f32 to vector<8x128xf32>
    %14 = arith.subf %13, %4 : vector<8x128xf32>
    %cst_7 = arith.constant 1.000000e+00 : f32
    %15 = vector.broadcast %cst_7 : f32 to vector<8x128xf32>
    %16 = arith.mulf %15, %14 : vector<8x128xf32>
    %cst_8 = arith.constant 1.000000e+00 : f32
    %17 = vector.broadcast %cst_8 : f32 to vector<8x128xf32>
    %18 = arith.subf %17, %8 : vector<8x128xf32>
    %19 = math.log %18 : vector<8x128xf32>
    %20 = arith.mulf %16, %19 : vector<8x128xf32>
    %21 = arith.addf %12, %20 : vector<8x128xf32>
    %cst_9 = arith.constant 0.000000e+00 : f32
    %22 = vector.broadcast %cst_9 : f32 to vector<8x128xf32>
    %23 = arith.subf %22, %21 : vector<8x128xf32>
    %24 = tpu.iota {dimensions = array<i32: 0>} : vector<8x128xi32>
    %25 = tpu.iota {dimensions = array<i32: 1>} : vector<8x128xi32>
    %c8_i32 = arith.constant 8 : i32
    %26 = arith.muli %arg0, %c8_i32 : i32
    %27 = vector.broadcast %26 : i32 to vector<8x128xi32>
    %28 = arith.addi %27, %24 : vector<8x128xi32>
    %c128_i32 = arith.constant 128 : i32
    %29 = vector.broadcast %c128_i32 : i32 to vector<8x128xi32>
    %30 = arith.muli %28, %29 : vector<8x128xi32>
    %31 = arith.addi %30, %25 : vector<8x128xi32>
    %c16_i32 = arith.constant 16 : i32
    %32 = vector.broadcast %c16_i32 : i32 to vector<8x128xi32>
    %33 = arith.cmpi slt, %31, %32 : vector<8x128xi32>
    %cst_10 = arith.constant 0.000000e+00 : f32
    %34 = vector.broadcast %cst_10 : f32 to vector<8x128xf32>
    %35 = arith.select %33, %23, %34 : vector<8x128xi1>, vector<8x128xf32>
    %c0_11 = arith.constant 0 : index
    %c0_12 = arith.constant 0 : index
    %36 = vector.load %arg4[%c0_11, %c0_12] : memref<1x128xf32, #tpu.memory_space<vmem>>, vector<1x128xf32>
    %cst_13 = arith.constant dense<0.000000e+00> : vector<128xf32>
    %37 = vector.multi_reduction <add>, %35, %cst_13 [0] : vector<8x128xf32> to vector<128xf32>
    %38 = vector.shape_cast %37 : vector<128xf32> to vector<1x128xf32>
    %39 = arith.addf %36, %38 : vector<1x128xf32>
    %c0_14 = arith.constant 0 : index
    %c0_15 = arith.constant 0 : index
    %40 = vector.load %arg4[%c0_14, %c0_15] : memref<1x128xf32, #tpu.memory_space<vmem>>, vector<1x128xf32>
    tpu.vector_store %arg4[%c0_14, %c0_15], %39 {strides = array<i32>} : memref<1x128xf32, #tpu.memory_space<vmem>>, vector<1x128xf32>,
    %c0_i32_16 = arith.constant 0 : i32
    %41 = arith.cmpi eq, %arg0, %c0_i32_16 : i32
    %42 = arith.extui %41 : i1 to i32
    %c0_i32_17 = arith.constant 0 : i32
    %43 = arith.cmpi ne, %42, %c0_i32_17 : i32
    scf.if %43 {
      %c0_18 = arith.constant 0 : index
      %c0_19 = arith.constant 0 : index
      %44 = vector.load %arg4[%c0_18, %c0_19] : memref<1x128xf32, #tpu.memory_space<vmem>>, vector<1x128xf32>
      %45 = vector.shape_cast %44 : vector<1x128xf32> to vector<1x1x128xf32>
      %cst_20 = arith.constant dense<0.000000e+00> : vector<1xf32>
      %46 = vector.multi_reduction <add>, %45, %cst_20 [1, 2] : vector<1x1x128xf32> to vector<1xf32>
      %47 = vector.shape_cast %46 : vector<1xf32> to vector<1x1x1xf32>
      %48 = vector.extract %47[0, 0, 0] : f32 from vector<1x1x1xf32>
      %cst_21 = arith.constant 1.600000e+01 : f32
      %49 = arith.divf %48, %cst_21 : f32
      %c0_22 = arith.constant 0 : index
      %50 = memref.load %arg3[%c0_22] : memref<1xf32, #tpu.memory_space<smem>>
      memref.store %49, %arg3[%c0_22] : memref<1xf32, #tpu.memory_space<smem>>
    } else {
    }
    return
  }
  func.func @transform_0(%arg0: i32) -> (i32, i32) {
    %c0_i32 = arith.constant 0 : i32
    %c0_i32_0 = arith.constant 0 : i32
    return %arg0, %c0_i32 : i32, i32
  }
  func.func @transform_1(%arg0: i32) -> (i32, i32) {
    %c0_i32 = arith.constant 0 : i32
    %c0_i32_0 = arith.constant 0 : i32
    return %arg0, %c0_i32 : i32, i32
  }
  func.func @transform_2(%arg0: i32) -> i32 {
    %c0_i32 = arith.constant 0 : i32
    %c0_i32_0 = arith.constant 0 : i32
    return %c0_i32 : i32
  }
}

</mosaic_0001>

<bundles_post_ra>
// kernel: tpu_custom_call.1
= control target key start
LH: loop header
LB: loop body
LE: loop exit
PB: predicated region body
PF: predicated region fallthrough
CT: control target
= control target key end

     0   :  { %7 = vsyncpa [#allocation4], 0  ;;  %s202_s0 = inlined_call_operand.hbm [shape: f32[8,128], index: 0, kind: input, shape index: {}]   ;;  %s203_s1 = inlined_call_operand.hbm [shape: f32[8,128], index: 1, kind: input, shape index: {}]   ;;  %s204_s2 = inlined_call_operand.hbm [shape: f32[1], index: 2, kind: output, shape index: {}]  }
   0x1   :  { %8 = vsyncpa [#allocation7], 0 }
   0x2   :  { %9 = vsyncpa [#allocation5], 0  ;;  %s174_s9 = smov [#allocation3]   ;;  %s175_s11 = smov [#allocation6]  }
   0x3   :  { %s16_s10 = sshll.u32 %s174_s9, 4  ;;  %s26_s12 = sshll.u32 %s175_s11, 4  ;;  %s17_s10 = int_to_ptr.vmem [resolvable:$true] %s16_s10  ;;  %s27_s12 = int_to_ptr.vmem [resolvable:$true] %s26_s12 }
   0x4   :  { %s128_s13 = scalar_lea.vmem %s17_s10, 128  ;;  %p133_p1 = scmp.lt.s32.totalorder %s17_s10, %s17_s10 }
   0x5   :  { %p129_p0 = scmp.ne.s32.totalorder %s17_s10, %s128_s13  ;;  %p134_p2 = scmp.lt.s32.totalorder %s128_s13, %s128_s13 }
   0x7   :  { %p135_p3 = por %p134_p2, %p133_p1 }
   0x9   :  { %p136_p4 = pnand %p135_p3, %p129_p0 }
   0xb   :  { %139 = shalt.err (!%p136_p4)
}
   0xc   :  { %19 = dma.hbm_to_vmem [thread:$0]  %s202_s0, 128, %s17_s10, [#allocation4]  }
   0xd   :  { %s148_s16 = scalar_lea.vmem %s27_s12, 128  ;;  %p153_p6 = scmp.lt.s32.totalorder %s27_s12, %s27_s12 }
   0xe   :  { %p149_p5 = scmp.ne.s32.totalorder %s27_s12, %s148_s16  ;;  %p154_p7 = scmp.lt.s32.totalorder %s148_s16, %s148_s16 }
  0x10   :  { %p155_p8 = por %p154_p7, %p153_p6 }
  0x12   :  { %p156_p9 = pnand %p155_p8, %p149_p5 }
  0x14   :  { %159 = shalt.err (!%p156_p9)
}
  0x15   :  { %29 = dma.hbm_to_vmem [thread:$0]  %s203_s1, 128, %s27_s12, [#allocation7]  }
  0x16   :  { %168 = dma.done.wait [#allocation4], 128  }
  0x17   :  { %169 = vsyncadd [#allocation4], 4294967168 }
  0x18   :  { %170 = dma.done.wait [#allocation7], 128  }
  0x19   :  { %171 = vsyncadd [#allocation7], 4294967168  ;;  %v176_v0 = vmov 0.0   ;;  %v41_v1 = vld [vmem:[#allocation3] sm:$0xff]  ;;  %v55_v5 = vlaneseq  ;;  %v42_v7 = vld [vmem:[#allocation6] sm:$0xff]  ;;  %vm79_vm1 = vcmask 1040384  }
  0x1a   :  { %40 = vst [vmem:[#allocation2] sm:$0x1] %v176_v0  ;;  %v43_v2 = vmax.f32 %v41_v1, 1e-07  ;;  %v48_v12 = vsub.f32 1.0, %v42_v7  ;;  %s177_s19 = smov [#allocation8]  }
  0x1b   :  { %v56_v6 = vshrl.u32 %v55_v5, 7  ;;  %v58_v9 = vand.u32 127, %v55_v5 }
  0x1c   :  { %v44_v3 = vmin.f32 %v43_v2, 0.9999999 }
  0x1d   :  { %v62_v10 = vmul.u32 128, %v56_v6 }
  0x1e   :  { %116 = vlog2.f32 %v44_v3  ;;  %v49_v4 = vsub.f32 1.0, %v44_v3 }
  0x1f   :  { %v63_v16 = vadd.s32 %v62_v10, %v58_v9 }
  0x20   :  { %118 = vlog2.f32 %v49_v4 }
  0x21   :  { %vm64_vm0 = vcmp.lt.s32.totalorder %v63_v16, 16  ;;  %v66_v26 = vld [vmem:[#allocation2] sm:$0x1] }
  0x2b   :  { %v117_v8 = vpop.eup %116 }
  0x2c   :  { %v46_v11 = vmul.f32 0.6931472, %v117_v8 }
  0x2d   :  { %v119_v13 = vpop.eup %118 }
  0x2e   :  { %v47_v14 = vmul.f32 %v46_v11, %v42_v7  ;;  %v51_v15 = vmul.f32 0.6931472, %v119_v13 }
  0x30   :  { %v52_v17 = vmul.f32 %v51_v15, %v48_v12 }
  0x32   :  { %v53_v18 = vadd.f32 %v52_v17, %v47_v14 }
  0x34   :  { %v54_v19 = vsub.f32 0.0, %v53_v18 }
  0x36   :  { %v65_v20 = vsel %vm64_vm0, %v54_v19, 0.0 }
  0x37   :  { %v67_v21 = vrot.slane %v65_v20, 4 }
  0x39   :  { %v68_v22 = vadd.f32 %v67_v21, %v65_v20 }
  0x3b   :  { %v69_v23 = vrot.slane %v68_v22, 2 }
  0x3d   :  { %v70_v24 = vadd.f32 %v69_v23, %v68_v22 }
  0x3f   :  { %v71_v25 = vrot.slane %v70_v24, 1 }
  0x41   :  { %v72_v27 = vadd.f32 %v71_v25, %v70_v24 }
  0x43   :  { %v73_v28 = vadd.f32 %v72_v27, %v66_v26 }
  0x45   :  { %74 = vst [vmem:[#allocation2] sm:$0x1] %v73_v28 }
  0x4c   :  { %v78_v29 = vld [vmem:[#allocation2] sm:$0x1] }
  0x4d   :  { %v80_v30 = vsel %vm79_vm1, %v78_v29, 0.0 }
  0x4e   :  { %81 = vadd.xlane.f32.xlu0 %v80_v30 }
  0xd7   :  { %v82_v31 = vpop.xlane.xlu0 %81 }
  0xd8   :  { %v83_v32 = vrot.slane %v82_v31, 4 }
  0xda   :  { %v84_v33 = vadd.f32 %v83_v32, %v82_v31 }
  0xdc   :  { %v85_v34 = vrot.slane %v84_v33, 2 }
  0xde   :  { %v86_v35 = vadd.f32 %v85_v34, %v84_v33 }
  0xe0   :  { %v87_v36 = vrot.slane %v86_v35, 1 }
  0xe2   :  { %v88_v37 = vadd.f32 %v87_v36, %v86_v35 }
  0xe4   :  { %110 = vpush %v88_v37 }
 0x115   :  { %s111_s0 = spop %110 }
 0x116   :  { %s92_s1 = smul.f32 0.0625, %s111_s0 }
 0x118   :  { %94 = sst [smem:[#allocation8]] %s92_s1 }
 0x119   :  { %102 = dma.smem_to_hbm %s177_s19, 16, %s204_s2, [#allocation5]  }
 0x11a   :  { %172 = dma.done.wait [#allocation5], 16  }
 0x11b   :  { %173 = vsyncadd [#allocation5], 4294967280 }
 0x11c   :  { %106 = sfence }
 0x11d   :  { %107 = vsyncpa [#allocation4], 1 }
 0x11e   :  { %108 = vsyncpa [#allocation7], 1 }
 0x11f   :  { %109 = vsyncpa [#allocation5], 1 }

</bundles_post_ra>
